<compile_context>
chip_gen: v5e
topology: v5e:2x2
jax: 0.10.0
libtpu: 0.0.40
codegen_flags: <defaults>
</compile_context>

<pallas_src>
import functools

import jax
import jax.numpy as jnp
from jax import lax
from jax.experimental import pallas as pl
from jax.experimental.pallas import tpu as pltpu


def _round_up(x, m):
    return (x + m - 1) // m * m


def _encoder_cosine_kernel(xm_ref, xd_ref, wm_ref, bm_ref, wd_ref, bd_ref,
                           out_ref, pm_acc, pd_acc, *, eps):
    """Fused mention/definition encoder + cosine-distance kernel.

    Grid = (batch tiles, seq tiles); seq is the trailing reduction axis.

    xm_ref, xd_ref : [TB, TL, Dp] token-embedding tiles (mention / definition)
    wm_ref, wd_ref : [Dp, Hp]     projection weights, pre-scaled by 1/L
                                  (whole-array VMEM residents, single copy)
    bm_ref, bd_ref : [1, Hp]      projection biases (VMEM residents)
    out_ref        : [1, 1, TB]   lane-dense cosine distance per pair
    pm_acc, pd_acc : [TB, Dp]     f32 running token sums (VMEM scratch)
    """
    l = pl.program_id(1)

    @pl.when(l == 0)
    def _init():
        pm_acc[...] = jnp.zeros_like(pm_acc)
        pd_acc[...] = jnp.zeros_like(pd_acc)

    # Running f32 token sums (no full-tensor f32 upcast of the token stream).
    # The mean-pool's 1/L is folded into the weights, so no rescale here.
    pm_acc[...] += jnp.sum(xm_ref[...], axis=1, dtype=jnp.float32)
    pd_acc[...] += jnp.sum(xd_ref[...], axis=1, dtype=jnp.float32)

    @pl.when(l == pl.num_programs(1) - 1)
    def _finalize():
        # Dense projection + tanh (BERT-pooler-style head): one MXU dot per
        # encoder per batch tile, off the token-streaming critical path.
        emb_m = jnp.tanh(
            jnp.dot(pm_acc[...], wm_ref[...],
                    preferred_element_type=jnp.float32) + bm_ref[...])
        emb_d = jnp.tanh(
            jnp.dot(pd_acc[...], wd_ref[...],
                    preferred_element_type=jnp.float32) + bd_ref[...])

        # Cosine distance per row: 1 - <a,b> * rsqrt(|a|^2 |b|^2 + eps).
        # eps inside rsqrt differs from the exact 1 - dot/(|a||b|) only for
        # near-zero-norm embeddings; numerically inert at normal scales.
        dot = jnp.sum(emb_m * emb_d, axis=-1)                  # [TB]
        nm2 = jnp.sum(emb_m * emb_m, axis=-1)
        nd2 = jnp.sum(emb_d * emb_d, axis=-1)
        cos = dot * lax.rsqrt(nm2 * nd2 + eps)
        out_ref[...] = (1.0 - cos).reshape(1, 1, -1)           # lane-dense


def mention_definition_cosine(x_mention, x_definition,
                              w_men, b_men, w_def, b_def, *, eps=1e-12):
    """Returns per-pair cosine distance, shape (B,)."""
    B, L, D = x_mention.shape
    H = w_men.shape[1]
    itemsize = jnp.dtype(x_mention.dtype).itemsize
    w_itemsize = jnp.dtype(w_men.dtype).itemsize

    # Sublane packing of the token dtype: 8 rows/vreg for f32, 16 for bf16,
    # 32 for int8/fp8 -> the seq tile (second-minor block dim) respects it.
    sublane = max(8, 32 // itemsize)

    # Lane-align hidden dims (zero padding is numerically inert).  D stays at
    # 128-alignment because it multiplies the streamed token bytes; when D/H
    # are already multiples of 256 this also matches the 2x256^2 MXU.
    d_pad = _round_up(D, 128)
    h_pad = _round_up(H, 128)

    # Batch tiling: minimize padded rows (padded rows = wasted HBM traffic in
    # a bandwidth-bound kernel) and give >= 2 tiles on non-tiny batches so the
    # "parallel" batch axis can shard across v7x's two TensorCores.
    if B > 16:
        n_bt = max(2, pl.cdiv(B, 128))
        tb = _round_up(pl.cdiv(B, n_bt), 8)
    else:
        tb = _round_up(max(B, 1), 8)
    n_bt = pl.cdiv(B, tb)
    b_pad = n_bt * tb

    # Generation-aware VMEM ceiling: 128 MiB parts (v5e/v6e) can take much
    # larger seq tiles; v7x has 64 MiB/TC so stay well under it (headroom for
    # Mosaic internal scratch).
    try:
        vmem_cap = pltpu.get_tpu_info().vmem_capacity_bytes
    except Exception:
        vmem_cap = 64 * 1024 * 1024
    if vmem_cap >= 100 * 1024 * 1024:          # v5e / v6e (128 MiB physical)
        vmem_ceiling = 96 * 1024 * 1024
    else:                                      # v7x (64 MiB per TC)
        vmem_ceiling = 48 * 1024 * 1024

    # Resident bytes: single-buffered weights/biases, f32 pooled-sum scratch,
    # output blocks, plus headroom for Mosaic-internal scratch.
    fixed_bytes = (2 * (d_pad * h_pad + h_pad) * w_itemsize
                   + 2 * tb * d_pad * 4
                   + 2 * n_bt * tb * 4
                   + 2 * 1024 * 1024)

    # Seq tile from the remaining budget: 2 token inputs x 2 pipeline buffers.
    # (Pipeline depth left at the default 2; deeper buffering only helps if
    #  profiling shows exposed DMA latency at small tiles.)
    token_budget = max(2 * 1024 * 1024, vmem_ceiling - fixed_bytes)
    tl_cap = token_budget // (4 * tb * d_pad * itemsize)
    tl_cap = max(sublane, tl_cap // sublane * sublane)
    tl = int(min(_round_up(L, sublane), tl_cap))
    l_pad = _round_up(L, tl)
    n_lt = l_pad // tl

    inv_len = 1.0 / float(L)   # real L (padded tokens are zero), not l_pad.

    def pad_tokens(x):
        return jnp.pad(x, ((0, b_pad - B), (0, l_pad - L), (0, d_pad - D)))

    xm = pad_tokens(x_mention)
    xd = pad_tokens(x_definition)
    # Fold the mean-pool 1/L into the (small) projection weights: free in the
    # wrapper, deletes two [TB, Dp] VPU multiplies per batch tile in-kernel.
    wm = jnp.pad(w_men * inv_len, ((0, d_pad - D), (0, h_pad - H)))
    wd = jnp.pad(w_def * inv_len, ((0, d_pad - D), (0, h_pad - H)))
    bm = jnp.pad(b_men, ((0, 0), (0, h_pad - H)))
    bd = jnp.pad(b_def, ((0, 0), (0, h_pad - H)))

    grid = (n_bt, n_lt)

    # Token tiles: double-buffered streaming DMA over the seq reduction axis.
    x_spec = pl.BlockSpec((tb, tl, d_pad), lambda b, l: (b, l, 0))
    # Constant operands: whole-array VMEM residents -> exactly one copy, no
    # dead second pipeline buffer.
    const_spec = pl.BlockSpec(memory_space=pltpu.MemorySpace.VMEM)
    # Output (n_bt, 1, tb) keeps the batch on the lane axis while the block
    # equals the full last-two dims, so tb needs no 128-multiple constraint.
    out_spec = pl.BlockSpec((1, 1, tb), lambda b, l: (b, 0, 0))

    vmem_limit = int(min(vmem_ceiling,
                         max(8 * 1024 * 1024,
                             fixed_bytes + 4 * tb * tl * d_pad * itemsize)))

    kernel = functools.partial(_encoder_cosine_kernel, eps=float(eps))

    out = pl.pallas_call(
        kernel,
        out_shape=jax.ShapeDtypeStruct((n_bt, 1, tb), jnp.float32),
        grid_spec=pltpu.PrefetchScalarGridSpec(
            num_scalar_prefetch=0,
            grid=grid,
            in_specs=[x_spec, x_spec, const_spec, const_spec,
                      const_spec, const_spec],
            out_specs=out_spec,
            scratch_shapes=[pltpu.VMEM((tb, d_pad), jnp.float32),
                            pltpu.VMEM((tb, d_pad), jnp.float32)]),
        compiler_params=pltpu.CompilerParams(
            dimension_semantics=("parallel", "arbitrary"),
            vmem_limit_bytes=vmem_limit),
    )(xm, xd, wm, bm, wd, bd)

    # Tiles are laid out in batch order; padded rows sit at the end.
    return out.reshape(-1)[:B]


def _reference(x_mention, x_definition, w_men, b_men, w_def, b_def):
    """Pure-JAX reference for correctness checking."""
    pm = jnp.mean(x_mention, axis=1)
    pd = jnp.mean(x_definition, axis=1)
    em = jnp.tanh(pm @ w_men + b_men)
    ed = jnp.tanh(pd @ w_def + b_def)
    dot = jnp.sum(em * ed, axis=-1)
    nm = jnp.linalg.norm(em, axis=-1)
    nd = jnp.linalg.norm(ed, axis=-1)
    return 1.0 - dot / (nm * nd)


if __name__ == "__main__":
    B, L, D, H = 8, 8, 32, 32   # batch, max_len (seq), token-embed dim, hidden

    key = jax.random.PRNGKey(0)
    k1, k2, k3, k4, k5, k6 = jax.random.split(key, 6)

    # "Tokenized + embedded" mention-context and definition sentences.
    x_men = jax.random.normal(k1, (B, L, D), dtype=jnp.float32)
    x_def = jax.random.normal(k2, (B, L, D), dtype=jnp.float32)

    # Deterministic synthetic encoder parameters (mention / definition).
    w_men = jax.random.normal(k3, (D, H), dtype=jnp.float32) / jnp.sqrt(D)
    b_men = jax.random.normal(k4, (1, H), dtype=jnp.float32) * 0.02
    w_def = jax.random.normal(k5, (D, H), dtype=jnp.float32) / jnp.sqrt(D)
    b_def = jax.random.normal(k6, (1, H), dtype=jnp.float32) * 0.02

    cos_dist = mention_definition_cosine(x_men, x_def,
                                         w_men, b_men, w_def, b_def)
    cos_dist = jax.block_until_ready(cos_dist)

    ref = _reference(x_men, x_def, w_men, b_men, w_def, b_def)
    assert cos_dist.shape == (B,)
    assert jnp.allclose(cos_dist, ref, atol=1e-5, rtol=1e-5), (
        f"mismatch: {cos_dist} vs {ref}")

    print("KERNEL_OK")
</pallas_src>

<mosaic_0001>
module attributes {stable_mosaic.version = 11 : i64} {
  func.func @_encoder_cosine_kernel(%arg0: i32, %arg1: i32, %arg2: memref<8x8x128xf32, #tpu.memory_space<vmem>>, %arg3: memref<8x8x128xf32, #tpu.memory_space<vmem>>, %arg4: memref<128x128xf32, #tpu.memory_space<vmem>>, %arg5: memref<1x128xf32, #tpu.memory_space<vmem>>, %arg6: memref<128x128xf32, #tpu.memory_space<vmem>>, %arg7: memref<1x128xf32, #tpu.memory_space<vmem>>, %arg8: memref<1x1x8xf32, #tpu.memory_space<vmem>>, %arg9: memref<8x128xf32, #tpu.memory_space<vmem>>, %arg10: memref<8x128xf32, #tpu.memory_space<vmem>>) attributes {dimension_semantics = [#tpu.dimension_semantics<parallel>, #tpu.dimension_semantics<arbitrary>], iteration_bounds = array<i64: 1, 1>, scalar_prefetch = 0 : i64, scratch_operands = 2 : i64, tpu.core_type = #tpu.core_type<tc>, window_params = [{transform_indices = @transform_0, window_bounds = array<i64: 8, 8, 128>}, {transform_indices = @transform_1, window_bounds = array<i64: 8, 8, 128>}, {pipeline_mode = #tpu.pipeline_mode<synchronous>, transform_indices = @transform_2, window_bounds = array<i64: 128, 128>}, {pipeline_mode = #tpu.pipeline_mode<synchronous>, transform_indices = @transform_3, window_bounds = array<i64: 1, 128>}, {pipeline_mode = #tpu.pipeline_mode<synchronous>, transform_indices = @transform_4, window_bounds = array<i64: 128, 128>}, {pipeline_mode = #tpu.pipeline_mode<synchronous>, transform_indices = @transform_5, window_bounds = array<i64: 1, 128>}, {transform_indices = @transform_6, window_bounds = array<i64: 1, 1, 8>}]} {
    %c0_i32 = arith.constant 0 : i32
    %0 = arith.cmpi eq, %arg1, %c0_i32 : i32
    %1 = arith.extui %0 : i1 to i32
    %c0_i32_0 = arith.constant 0 : i32
    %2 = arith.cmpi ne, %1, %c0_i32_0 : i32
    scf.if %2 {
      %cst_17 = arith.constant 0.000000e+00 : f32
      %16 = vector.broadcast %cst_17 : f32 to vector<8x128xf32>
      %c0_18 = arith.constant 0 : index
      %c0_19 = arith.constant 0 : index
      %17 = vector.load %arg9[%c0_18, %c0_19] : memref<8x128xf32, #tpu.memory_space<vmem>>, vector<8x128xf32>
      tpu.vector_store %arg9[%c0_18, %c0_19], %16 {strides = array<i32>} : memref<8x128xf32, #tpu.memory_space<vmem>>, vector<8x128xf32>,
      %cst_20 = arith.constant 0.000000e+00 : f32
      %18 = vector.broadcast %cst_20 : f32 to vector<8x128xf32>
      %c0_21 = arith.constant 0 : index
      %c0_22 = arith.constant 0 : index
      %19 = vector.load %arg10[%c0_21, %c0_22] : memref<8x128xf32, #tpu.memory_space<vmem>>, vector<8x128xf32>
      tpu.vector_store %arg10[%c0_21, %c0_22], %18 {strides = array<i32>} : memref<8x128xf32, #tpu.memory_space<vmem>>, vector<8x128xf32>,
    } else {
    }
    %c0 = arith.constant 0 : index
    %c0_1 = arith.constant 0 : index
    %3 = vector.load %arg9[%c0, %c0_1] : memref<8x128xf32, #tpu.memory_space<vmem>>, vector<8x128xf32>
    %c0_2 = arith.constant 0 : index
    %c0_3 = arith.constant 0 : index
    %c0_4 = arith.constant 0 : index
    %4 = vector.load %arg2[%c0_2, %c0_3, %c0_4] : memref<8x8x128xf32, #tpu.memory_space<vmem>>, vector<8x8x128xf32>
    %cst = arith.constant dense<0.000000e+00> : vector<8x128xf32>
    %5 = vector.multi_reduction <add>, %4, %cst [1] : vector<8x8x128xf32> to vector<8x128xf32>
    %6 = arith.addf %3, %5 : vector<8x128xf32>
    %c0_5 = arith.constant 0 : index
    %c0_6 = arith.constant 0 : index
    %7 = vector.load %arg9[%c0_5, %c0_6] : memref<8x128xf32, #tpu.memory_space<vmem>>, vector<8x128xf32>
    tpu.vector_store %arg9[%c0_5, %c0_6], %6 {strides = array<i32>} : memref<8x128xf32, #tpu.memory_space<vmem>>, vector<8x128xf32>,
    %c0_7 = arith.constant 0 : index
    %c0_8 = arith.constant 0 : index
    %8 = vector.load %arg10[%c0_7, %c0_8] : memref<8x128xf32, #tpu.memory_space<vmem>>, vector<8x128xf32>
    %c0_9 = arith.constant 0 : index
    %c0_10 = arith.constant 0 : index
    %c0_11 = arith.constant 0 : index
    %9 = vector.load %arg3[%c0_9, %c0_10, %c0_11] : memref<8x8x128xf32, #tpu.memory_space<vmem>>, vector<8x8x128xf32>
    %cst_12 = arith.constant dense<0.000000e+00> : vector<8x128xf32>
    %10 = vector.multi_reduction <add>, %9, %cst_12 [1] : vector<8x8x128xf32> to vector<8x128xf32>
    %11 = arith.addf %8, %10 : vector<8x128xf32>
    %c0_13 = arith.constant 0 : index
    %c0_14 = arith.constant 0 : index
    %12 = vector.load %arg10[%c0_13, %c0_14] : memref<8x128xf32, #tpu.memory_space<vmem>>, vector<8x128xf32>
    tpu.vector_store %arg10[%c0_13, %c0_14], %11 {strides = array<i32>} : memref<8x128xf32, #tpu.memory_space<vmem>>, vector<8x128xf32>,
    %c0_i32_15 = arith.constant 0 : i32
    %13 = arith.cmpi eq, %arg1, %c0_i32_15 : i32
    %14 = arith.extui %13 : i1 to i32
    %c0_i32_16 = arith.constant 0 : i32
    %15 = arith.cmpi ne, %14, %c0_i32_16 : i32
    scf.if %15 {
      %c0_17 = arith.constant 0 : index
      %c0_18 = arith.constant 0 : index
      %16 = vector.load %arg9[%c0_17, %c0_18] : memref<8x128xf32, #tpu.memory_space<vmem>>, vector<8x128xf32>
      %c0_19 = arith.constant 0 : index
      %c0_20 = arith.constant 0 : index
      %17 = vector.load %arg4[%c0_19, %c0_20] : memref<128x128xf32, #tpu.memory_space<vmem>>, vector<128x128xf32>
      %cst_21 = arith.constant dense<0.000000e+00> : vector<8x128xf32>
      %18 = tpu.matmul %16, %17, %cst_21 {dimension_numbers = #tpu.dot_dimension_numbers<[1], [0], [0], [1], [0, 0, 1, 1], [], []>} : vector<8x128xf32>, vector<128x128xf32>, vector<8x128xf32> -> vector<8x128xf32>
      %c0_22 = arith.constant 0 : index
      %c0_23 = arith.constant 0 : index
      %19 = vector.load %arg5[%c0_22, %c0_23] : memref<1x128xf32, #tpu.memory_space<vmem>>, vector<1x128xf32>
      %20 = vector.broadcast %19 : vector<1x128xf32> to vector<8x128xf32>
      %21 = arith.addf %18, %20 : vector<8x128xf32>
      %22 = math.tanh %21 : vector<8x128xf32>
      %c0_24 = arith.constant 0 : index
      %c0_25 = arith.constant 0 : index
      %23 = vector.load %arg10[%c0_24, %c0_25] : memref<8x128xf32, #tpu.memory_space<vmem>>, vector<8x128xf32>
      %c0_26 = arith.constant 0 : index
      %c0_27 = arith.constant 0 : index
      %24 = vector.load %arg6[%c0_26, %c0_27] : memref<128x128xf32, #tpu.memory_space<vmem>>, vector<128x128xf32>
      %cst_28 = arith.constant dense<0.000000e+00> : vector<8x128xf32>
      %25 = tpu.matmul %23, %24, %cst_28 {dimension_numbers = #tpu.dot_dimension_numbers<[1], [0], [0], [1], [0, 0, 1, 1], [], []>} : vector<8x128xf32>, vector<128x128xf32>, vector<8x128xf32> -> vector<8x128xf32>
      %c0_29 = arith.constant 0 : index
      %c0_30 = arith.constant 0 : index
      %26 = vector.load %arg7[%c0_29, %c0_30] : memref<1x128xf32, #tpu.memory_space<vmem>>, vector<1x128xf32>
      %27 = vector.broadcast %26 : vector<1x128xf32> to vector<8x128xf32>
      %28 = arith.addf %25, %27 : vector<8x128xf32>
      %29 = math.tanh %28 : vector<8x128xf32>
      %30 = arith.mulf %22, %29 : vector<8x128xf32>
      %cst_31 = arith.constant dense<0.000000e+00> : vector<8xf32>
      %31 = vector.multi_reduction <add>, %30, %cst_31 [1] : vector<8x128xf32> to vector<8xf32>
      %32 = arith.mulf %22, %22 : vector<8x128xf32>
      %cst_32 = arith.constant dense<0.000000e+00> : vector<8xf32>
      %33 = vector.multi_reduction <add>, %32, %cst_32 [1] : vector<8x128xf32> to vector<8xf32>
      %34 = arith.mulf %29, %29 : vector<8x128xf32>
      %cst_33 = arith.constant dense<0.000000e+00> : vector<8xf32>
      %35 = vector.multi_reduction <add>, %34, %cst_33 [1] : vector<8x128xf32> to vector<8xf32>
      %36 = arith.mulf %33, %35 : vector<8xf32>
      %cst_34 = arith.constant 9.99999996E-13 : f32
      %37 = vector.broadcast %cst_34 : f32 to vector<8xf32>
      %38 = arith.addf %36, %37 : vector<8xf32>
      %39 = math.rsqrt %38 : vector<8xf32>
      %40 = arith.mulf %31, %39 : vector<8xf32>
      %cst_35 = arith.constant 1.000000e+00 : f32
      %41 = vector.broadcast %cst_35 : f32 to vector<8xf32>
      %42 = arith.subf %41, %40 : vector<8xf32>
      %43 = vector.shape_cast %42 : vector<8xf32> to vector<1x1x8xf32>
      %c0_36 = arith.constant 0 : index
      %c0_37 = arith.constant 0 : index
      %c0_38 = arith.constant 0 : index
      %44 = vector.load %arg8[%c0_36, %c0_37, %c0_38] : memref<1x1x8xf32, #tpu.memory_space<vmem>>, vector<1x1x8xf32>
      tpu.vector_store %arg8[%c0_36, %c0_37, %c0_38], %43 {strides = array<i32>} : memref<1x1x8xf32, #tpu.memory_space<vmem>>, vector<1x1x8xf32>,
    } else {
    }
    return
  }
  func.func @transform_0(%arg0: i32, %arg1: i32) -> (i32, i32, i32) {
    %c0_i32 = arith.constant 0 : i32
    %c0_i32_0 = arith.constant 0 : i32
    return %arg0, %arg1, %c0_i32 : i32, i32, i32
  }
  func.func @transform_1(%arg0: i32, %arg1: i32) -> (i32, i32, i32) {
    %c0_i32 = arith.constant 0 : i32
    %c0_i32_0 = arith.constant 0 : i32
    return %arg0, %arg1, %c0_i32 : i32, i32, i32
  }
  func.func @transform_2(%arg0: i32, %arg1: i32) -> (i32, i32) {
    %c0_i32 = arith.constant 0 : i32
    %c0_i32_0 = arith.constant 0 : i32
    %c0_i32_1 = arith.constant 0 : i32
    return %c0_i32, %c0_i32_0 : i32, i32
  }
  func.func @transform_3(%arg0: i32, %arg1: i32) -> (i32, i32) {
    %c0_i32 = arith.constant 0 : i32
    %c0_i32_0 = arith.constant 0 : i32
    %c0_i32_1 = arith.constant 0 : i32
    return %c0_i32, %c0_i32_0 : i32, i32
  }
  func.func @transform_4(%arg0: i32, %arg1: i32) -> (i32, i32) {
    %c0_i32 = arith.constant 0 : i32
    %c0_i32_0 = arith.constant 0 : i32
    %c0_i32_1 = arith.constant 0 : i32
    return %c0_i32, %c0_i32_0 : i32, i32
  }
  func.func @transform_5(%arg0: i32, %arg1: i32) -> (i32, i32) {
    %c0_i32 = arith.constant 0 : i32
    %c0_i32_0 = arith.constant 0 : i32
    %c0_i32_1 = arith.constant 0 : i32
    return %c0_i32, %c0_i32_0 : i32, i32
  }
  func.func @transform_6(%arg0: i32, %arg1: i32) -> (i32, i32, i32) {
    %c0_i32 = arith.constant 0 : i32
    %c0_i32_0 = arith.constant 0 : i32
    %c0_i32_1 = arith.constant 0 : i32
    return %arg0, %c0_i32, %c0_i32_0 : i32, i32, i32
  }
}

</mosaic_0001>

<bundles_post_ra>
// kernel: tpu_custom_call.1
= control target key start
LH: loop header
LB: loop body
LE: loop exit
PB: predicated region body
PF: predicated region fallthrough
CT: control target
= control target key end

     0   :  { %11 = vsyncpa [#allocation5], 0  ;;  %s606_s0 = inlined_call_operand.hbm [shape: f32[8,8,128], index: 0, kind: input, shape index: {}]   ;;  %s607_s1 = inlined_call_operand.hbm [shape: f32[8,8,128], index: 1, kind: input, shape index: {}]   ;;  %s608_s2 = inlined_call_operand.hbm [shape: f32[128,128], index: 2, kind: input, shape index: {}]   ;;  %s609_s3 = inlined_call_operand.vmem [shape: f32[1,128], index: 3, kind: input, shape index: {}]   ;;  %s610_s4 = inlined_call_operand.hbm [shape: f32[128,128], index: 4, kind: input, shape index: {}]   ;;  %s611_s5 = inlined_call_operand.vmem [shape: f32[1,128], index: 5, kind: input, shape index: {}]   ;;  %s612_s6 = inlined_call_operand.hbm [shape: f32[1,1,8], index: 6, kind: output, shape index: {}]  }
   0x1   :  { %12 = vsyncpa [#allocation8], 0 }
   0x2   :  { %13 = vsyncpa [#allocation11], 0 }
   0x3   :  { %14 = vsyncpa [#allocation6], 0  ;;  %s32_s23 = sshll.u32 %s607_s1, 4  ;;  %s529_s24 = smov [#allocation7]   ;;  %s33_s23 = int_to_ptr.hbm [resolvable:$true] %s32_s23 }
   0x4   :  { %s34_s25 = sshll.u32 %s529_s24, 4  ;;  %s19_s28 = sshll.u32 %s606_s0, 4  ;;  %s35_s25 = int_to_ptr.vmem [resolvable:$true] %s34_s25  ;;  %s20_s28 = int_to_ptr.hbm [resolvable:$true] %s19_s28 }
   0x5   :  { %s530_s29 = smov 128   ;;  %s531_s30 = smov 8  }
   0x6   :  { %40 = dma.hbm_to_vmem [thread:$0]  %s33_s23, 1024, %s35_s25, [#allocation8], %s530_s29, %s530_s29, %s531_s30  }
   0x7   :  { %s532_s7 = smov [#allocation4]   ;;  %s45_s11 = sshll.u32 %s608_s2, 4  ;;  %s46_s11 = int_to_ptr.hbm [resolvable:$true] %s45_s11 }
   0x8   :  { %s21_s8 = sshll.u32 %s532_s7, 4  ;;  %s60_s13 = sshll.u32 %s610_s4, 4  ;;  %s22_s8 = int_to_ptr.vmem [resolvable:$true] %s21_s8  ;;  %s61_s13 = int_to_ptr.hbm [resolvable:$true] %s60_s13 }
   0x9   :  { %27 = dma.hbm_to_vmem [thread:$0]  %s20_s28, 1024, %s22_s8, [#allocation5], %s530_s29, %s530_s29, %s531_s30  }
   0xa   :  { %s533_s14 = smov [#allocation9]   ;;  %s534_s0 = smov [#allocation10]  }
   0xb   :  { %s47_s15 = sshll.u32 %s533_s14, 4  ;;  %s62_s16 = sshll.u32 %s534_s0, 4  ;;  %s48_s15 = int_to_ptr.vmem [resolvable:$true] %s47_s15  ;;  %s63_s16 = int_to_ptr.vmem [resolvable:$true] %s62_s16 }
   0xc   :  { %53 = dma.hbm_to_vmem [thread:$0]  %s46_s11, 2048, %s48_s15, [#allocation8], %s530_s29, %s530_s29, %s531_s30  }
   0xd   :  { %68 = dma.hbm_to_vmem [thread:$0]  %s61_s13, 2048, %s63_s16, [#allocation11], %s530_s29, %s530_s29, %s531_s30  }
   0xe   :  { %521 = dma.done.wait [#allocation5], 1024  }
   0xf   :  { %522 = vsyncadd [#allocation5], 4294966272 }
  0x10   :  { %523 = dma.done.wait [#allocation8], 3072  }
  0x11   :  { %524 = vsyncadd [#allocation8], 4294964224 }
  0x12   :  { %525 = dma.done.wait [#allocation11], 2048  }
  0x13   :  { %526 = vsyncadd [#allocation11], 4294965248  ;;  %v269_v0 = vld [vmem:[#allocation9 + $0x78] sm:$0xff]  ;;  %v268_v2 = vld [vmem:[#allocation9 + $0x70] sm:$0xff]  ;;  %vm158_vm0 = vcmask 1041409   ;;  %vm160_vm1 = vcmask 1042434  }
  0x14   :  { %v311_v1 = vld [vmem:[#allocation10 + $0x78] sm:$0xff]  ;;  %274 = vmatpush.msra.mxu0 %v269_v0  ;;  %v310_v3 = vld [vmem:[#allocation10 + $0x70] sm:$0xff]  ;;  %v267_v4 = vld [vmem:[#allocation9 + $0x68] sm:$0xff]  ;;  %vm162_vm2 = vcmask 1043459   ;;  %vm164_vm3 = vcmask 1044484   ;;  %vm166_vm4 = vcmask 1045509  }
  0x15   :  { %316 = vmatpush.msra.mxu1 %v311_v1  ;;  %v309_v5 = vld [vmem:[#allocation10 + $0x68] sm:$0xff]  ;;  %v266_v6 = vld [vmem:[#allocation9 + $0x60] sm:$0xff]  ;;  %v265_v8 = vld [vmem:[#allocation9 + $0x58] sm:$0xff]  ;;  %vm168_vm5 = vcmask 1046534   ;;  %vm170_vm6 = vcmask 1047559   ;;  %s374_s21 = sshll.u32 %s612_s6, 4  ;;  %s375_s21 = int_to_ptr.hbm [resolvable:$true] %s374_s21 }
  0x16   :  { %275 = vmatpush.msra.mxu0 %v268_v2  ;;  %v308_v7 = vld [vmem:[#allocation10 + $0x60] sm:$0xff]  ;;  %v307_v9 = vld [vmem:[#allocation10 + $0x58] sm:$0xff]  ;;  %v264_v10 = vld [vmem:[#allocation9 + $0x50] sm:$0xff]  ;;  %vm365_vm10 = vcmask 57344  }
  0x17   :  { %317 = vmatpush.msra.mxu1 %v310_v3  ;;  %v306_v11 = vld [vmem:[#allocation10 + $0x50] sm:$0xff]  ;;  %v263_v12 = vld [vmem:[#allocation9 + $0x48] sm:$0xff]  ;;  %v262_v14 = vld [vmem:[#allocation9 + $0x40] sm:$0xff] }
  0x18   :  { %276 = vmatpush.msra.mxu0 %v267_v4  ;;  %v305_v13 = vld [vmem:[#allocation10 + $0x48] sm:$0xff]  ;;  %v304_v15 = vld [vmem:[#allocation10 + $0x40] sm:$0xff]  ;;  %v96_v18 = vld [vmem:[#allocation4 + $0x10] sm:$0xff] }
  0x19   :  { %318 = vmatpush.msra.mxu1 %v309_v5  ;;  %v94_v16 = vld [vmem:[#allocation4] sm:$0xff]  ;;  %v95_v17 = vld [vmem:[#allocation4 + $0x8] sm:$0xff]  ;;  %v97_v19 = vld [vmem:[#allocation4 + $0x18] sm:$0xff]  ;;  %v114_v25 = vrot.slane %v96_v18, 4 }
  0x1a   :  { %277 = vmatpush.msra.mxu0 %v266_v6  ;;  %v102_v20 = vrot.slane %v94_v16, 4  ;;  %v98_v21 = vld [vmem:[#allocation4 + $0x20] sm:$0xff]  ;;  %v99_v22 = vld [vmem:[#allocation4 + $0x28] sm:$0xff]  ;;  %v100_v23 = vld [vmem:[#allocation4 + $0x30] sm:$0xff]  ;;  %v108_v24 = vrot.slane %v95_v17, 4  ;;  %v120_v26 = vrot.slane %v97_v19, 4 }
  0x1b   :  { %319 = vmatpush.msra.mxu1 %v308_v7  ;;  %v101_v27 = vld [vmem:[#allocation4 + $0x38] sm:$0xff]  ;;  %v126_v29 = vrot.slane %v98_v21, 4  ;;  %v132_v30 = vrot.slane %v99_v22, 4  ;;  %v138_v31 = vrot.slane %v100_v23, 4  ;;  %v115_v35 = vadd.f32 %v114_v25, %v96_v18  ;;  %v260_v38 = vld [vmem:[#allocation9 + $0x30] sm:$0xff]  ;;  %v259_v52 = vld [vmem:[#allocation9 + $0x28] sm:$0xff] }
  0x1c   :  { %278 = vmatpush.msra.mxu0 %v265_v8  ;;  %v103_v28 = vadd.f32 %v102_v20, %v94_v16  ;;  %v261_v32 = vld [vmem:[#allocation9 + $0x38] sm:$0xff]  ;;  %v109_v34 = vadd.f32 %v108_v24, %v95_v17  ;;  %v121_v36 = vadd.f32 %v120_v26, %v97_v19  ;;  %v144_v37 = vrot.slane %v101_v27, 4  ;;  %v302_v43 = vld [vmem:[#allocation10 + $0x30] sm:$0xff]  ;;  %v301_v53 = vld [vmem:[#allocation10 + $0x28] sm:$0xff] }
  0x1d   :  { %320 = vmatpush.msra.mxu1 %v307_v9  ;;  %v303_v33 = vld [vmem:[#allocation10 + $0x38] sm:$0xff]  ;;  %v127_v40 = vadd.f32 %v126_v29, %v98_v21  ;;  %v133_v41 = vadd.f32 %v132_v30, %v99_v22  ;;  %v139_v42 = vadd.f32 %v138_v31, %v100_v23  ;;  %v116_v45 = vrot.slane %v115_v35, 2  ;;  %v258_v62 = vld [vmem:[#allocation9 + $0x20] sm:$0xff]  ;;  %v181_v22 = vld [vmem:[#allocation7 + $0x28] sm:$0xff] }
  0x1e   :  { %279 = vmatpush.msra.mxu0 %v264_v10  ;;  %v104_v39 = vrot.slane %v103_v28, 2  ;;  %v110_v44 = vrot.slane %v109_v34, 2  ;;  %v122_v46 = vrot.slane %v121_v36, 2  ;;  %v145_v47 = vadd.f32 %v144_v37, %v101_v27  ;;  %v300_v63 = vld [vmem:[#allocation10 + $0x20] sm:$0xff]  ;;  %v257_v5 = vld [vmem:[#allocation9 + $0x18] sm:$0xff]  ;;  %v177_v10 = vld [vmem:[#allocation7 + $0x8] sm:$0xff] }
  0x1f   :  { %321 = vmatpush.msra.mxu1 %v306_v11  ;;  %v128_v49 = vrot.slane %v127_v40, 2  ;;  %v134_v50 = vrot.slane %v133_v41, 2  ;;  %v140_v51 = vrot.slane %v139_v42, 2  ;;  %v117_v55 = vadd.f32 %v116_v45, %v115_v35  ;;  %v176_v4 = vld [vmem:[#allocation7] sm:$0xff]  ;;  %v178_v11 = vld [vmem:[#allocation7 + $0x10] sm:$0xff]  ;;  %v179_v17 = vld [vmem:[#allocation7 + $0x18] sm:$0xff] }
  0x20   :  { %280 = vmatpush.msra.mxu0 %v263_v12  ;;  %v105_v48 = vadd.f32 %v104_v39, %v103_v28  ;;  %v111_v54 = vadd.f32 %v110_v44, %v109_v34  ;;  %v123_v56 = vadd.f32 %v122_v46, %v121_v36  ;;  %v146_v57 = vrot.slane %v145_v47, 2  ;;  %v299_v12 = vld [vmem:[#allocation10 + $0x18] sm:$0xff]  ;;  %v180_v18 = vld [vmem:[#allocation7 + $0x20] sm:$0xff]  ;;  %v256_v24 = vld [vmem:[#allocation9 + $0x10] sm:$0xff] }
  0x21   :  { %322 = vmatpush.msra.mxu1 %v305_v13  ;;  %v129_v59 = vadd.f32 %v128_v49, %v127_v40  ;;  %v135_v60 = vadd.f32 %v134_v50, %v133_v41  ;;  %v141_v61 = vadd.f32 %v140_v51, %v139_v42  ;;  %v118_v1 = vrot.slane %v117_v55, 1  ;;  %v298_v25 = vld [vmem:[#allocation10 + $0x10] sm:$0xff]  ;;  %v255_v34 = vld [vmem:[#allocation9 + $0x8] sm:$0xff]  ;;  %v254_v44 = vld [vmem:[#allocation9] sm:$0xff] }
  0x22   :  { %281 = vmatpush.msra.mxu0 %v262_v14  ;;  %v106_v58 = vrot.slane %v105_v48, 1  ;;  %v112_v0 = vrot.slane %v111_v54, 1  ;;  %v124_v2 = vrot.slane %v123_v56, 1  ;;  %v147_v3 = vadd.f32 %v146_v57, %v145_v47  ;;  %v297_v35 = vld [vmem:[#allocation10 + $0x8] sm:$0xff]  ;;  %v296_v45 = vld [vmem:[#allocation10] sm:$0xff]  ;;  %v182_v47 = vld [vmem:[#allocation7 + $0x30] sm:$0xff] }
  0x23   :  { %323 = vmatpush.msra.mxu1 %v304_v15  ;;  %v130_v7 = vrot.slane %v129_v59, 1  ;;  %v136_v8 = vrot.slane %v135_v60, 1  ;;  %v142_v9 = vrot.slane %v141_v61, 1  ;;  %v119_v14 = vadd.f32 %v118_v1, %v117_v55 }
  0x24   :  { %282 = vmatpush.msra.mxu0 %v261_v32  ;;  %v107_v6 = vadd.f32 %v106_v58, %v105_v48  ;;  %v113_v13 = vadd.f32 %v112_v0, %v111_v54  ;;  %v125_v15 = vadd.f32 %v124_v2, %v123_v56  ;;  %v148_v16 = vrot.slane %v147_v3, 1 }
  0x25   :  { %324 = vmatpush.msra.mxu1 %v303_v33  ;;  %v131_v19 = vadd.f32 %v130_v7, %v129_v59  ;;  %v137_v20 = vadd.f32 %v136_v8, %v135_v60  ;;  %v143_v21 = vadd.f32 %v142_v9, %v141_v61  ;;  %v184_v23 = vrot.slane %v176_v4, 4 }
  0x26   :  { %283 = vmatpush.msra.mxu0 %v260_v38  ;;  %v149_v26 = vadd.f32 %v148_v16, %v147_v3  ;;  %v159_v27 = vsel %vm158_vm0, %v113_v13, %v107_v6  ;;  %v190_v28 = vrot.slane %v177_v10, 4  ;;  %v196_v29 = vrot.slane %v178_v11, 4 }
  0x27   :  { %325 = vmatpush.msra.mxu1 %v302_v43  ;;  %v161_v30 = vsel %vm160_vm1, %v119_v14, %v159_v27  ;;  %v185_v31 = vadd.f32 %v184_v23, %v176_v4  ;;  %v202_v32 = vrot.slane %v179_v17, 4  ;;  %v208_v33 = vrot.slane %v180_v18, 4 }
  0x28   :  { %284 = vmatpush.msra.mxu0 %v259_v52  ;;  %v163_v36 = vsel %vm162_vm2, %v125_v15, %v161_v30  ;;  %v191_v37 = vadd.f32 %v190_v28, %v177_v10  ;;  %v197_v38 = vadd.f32 %v196_v29, %v178_v11  ;;  %v214_v39 = vrot.slane %v181_v22, 4  ;;  %v183_v52 = vld [vmem:[#allocation7 + $0x38] sm:$0xff]  ;;  %v393_v30 = vld [vmem:[%s609_s3] ss:$0 sm:$0xff]  ;;  %s535_s3 = smov [#allocation12]  }
  0x29   :  { %326 = vmatpush.msra.mxu1 %v301_v53  ;;  %v165_v40 = vsel %vm164_vm3, %v131_v19, %v163_v36  ;;  %v186_v41 = vrot.slane %v185_v31, 2  ;;  %v203_v42 = vadd.f32 %v202_v32, %v179_v17  ;;  %v209_v43 = vadd.f32 %v208_v33, %v180_v18 }
  0x2a   :  { %285 = vmatpush.msra.mxu0 %v258_v62  ;;  %v167_v46 = vsel %vm166_vm4, %v137_v20, %v165_v40  ;;  %v192_v48 = vrot.slane %v191_v37, 2  ;;  %v198_v49 = vrot.slane %v197_v38, 2  ;;  %v215_v50 = vadd.f32 %v214_v39, %v181_v22 }
  0x2b   :  { %327 = vmatpush.msra.mxu1 %v300_v63  ;;  %v169_v51 = vsel %vm168_vm5, %v143_v21, %v167_v46  ;;  %v187_v53 = vadd.f32 %v186_v41, %v185_v31  ;;  %v204_v54 = vrot.slane %v203_v42, 2  ;;  %v210_v55 = vrot.slane %v209_v43, 2 }
  0x2c   :  { %286 = vmatpush.msra.mxu0 %v257_v5  ;;  %v171_v56 = vsel %vm170_vm6, %v149_v26, %v169_v51  ;;  %v193_v57 = vadd.f32 %v192_v48, %v191_v37  ;;  %v199_v58 = vadd.f32 %v198_v49, %v197_v38  ;;  %v216_v59 = vrot.slane %v215_v50, 2 }
  0x2d   :  { %328 = vmatpush.msra.mxu1 %v299_v12  ;;  %v188_v60 = vrot.slane %v187_v53, 1  ;;  %v205_v61 = vadd.f32 %v204_v54, %v203_v42  ;;  %v211_v62 = vadd.f32 %v210_v55, %v209_v43  ;;  %v220_v63 = vrot.slane %v182_v47, 4 }
  0x2e   :  { %287 = vmatpush.msra.mxu0 %v256_v24  ;;  %v194_v0 = vrot.slane %v193_v57, 1  ;;  %v200_v1 = vrot.slane %v199_v58, 1  ;;  %v217_v2 = vadd.f32 %v216_v59, %v215_v50  ;;  %v226_v3 = vrot.slane %v183_v52, 4 }
  0x2f   :  { %329 = vmatpush.msra.mxu1 %v298_v25  ;;  %v189_v4 = vadd.f32 %v188_v60, %v187_v53  ;;  %v206_v5 = vrot.slane %v205_v61, 1  ;;  %v212_v6 = vrot.slane %v211_v62, 1  ;;  %v221_v7 = vadd.f32 %v220_v63, %v182_v47 }
  0x30   :  { %288 = vmatpush.msra.mxu0 %v255_v34  ;;  %v195_v8 = vadd.f32 %v194_v0, %v193_v57  ;;  %v201_v9 = vadd.f32 %v200_v1, %v199_v58  ;;  %v218_v10 = vrot.slane %v217_v2, 1  ;;  %v227_v11 = vadd.f32 %v226_v3, %v183_v52  ;;  %v394_v34 = vld [vmem:[%s611_s5] ss:$0 sm:$0xff]  ;;  %s372_s5 = sshll.u32 %s535_s3, 4  ;;  %s373_s5 = int_to_ptr.vmem [resolvable:$true] %s372_s5 }
  0x31   :  { %330 = vmatpush.msra.mxu1 %v297_v35  ;;  %v207_v12 = vadd.f32 %v206_v5, %v205_v61  ;;  %v213_v13 = vadd.f32 %v212_v6, %v211_v62  ;;  %v222_v14 = vrot.slane %v221_v7, 2  ;;  %v361_v50 = vlaneseq }
  0x32   :  { %289 = vmatpush.msra.mxu0 %v254_v44  ;;  %v219_v15 = vadd.f32 %v218_v10, %v217_v2  ;;  %v228_v16 = vrot.slane %v227_v11, 2  ;;  %v240_v17 = vsel %vm158_vm0, %v195_v8, %v189_v4 }
  0x33   :  { %331 = vmatpush.msra.mxu1 %v296_v45  ;;  %290 = vmatmul.f32.vlgmr.msra.gmra.mxu0 %v171_v56  ;;  %v223_v18 = vadd.f32 %v222_v14, %v221_v7  ;;  %v241_v19 = vsel %vm160_vm1, %v201_v9, %v240_v17  ;;  %v362_v55 = vand.u32 127, %v361_v50 }
  0x34   :  { %v229_v20 = vadd.f32 %v228_v16, %v227_v11  ;;  %v242_v21 = vsel %vm162_vm2, %v207_v12, %v241_v19 }
  0x35   :  { %v224_v22 = vrot.slane %v223_v18, 1  ;;  %v243_v23 = vsel %vm164_vm3, %v213_v13, %v242_v21 }
  0x36   :  { %v230_v24 = vrot.slane %v229_v20, 1  ;;  %v244_v25 = vsel %vm166_vm4, %v219_v15, %v243_v23 }
  0x37   :  { %v225_v26 = vadd.f32 %v224_v22, %v223_v18 }
  0x38   :  { %v231_v27 = vadd.f32 %v230_v24, %v229_v20 }
  0x39   :  { %v245_v28 = vsel %vm168_vm5, %v225_v26, %v244_v25 }
  0x3a   :  { %v246_v29 = vsel %vm170_vm6, %v231_v27, %v245_v28 }
  0x3b   :  { %332 = vmatmul.f32.vlgmr.msra.gmra.mxu1 %v246_v29 }
  0xb0   :  { %v291_v31 = vpop.f32.mrf.mxu0 }
  0xb1   :  { %v292_v32 = vadd.f32 %v393_v30, %v291_v31 }
  0xb3   :  { %395 = vtanh.f32 %v292_v32 }
  0xb8   :  { %v333_v36 = vpop.f32.mrf.mxu1 }
  0xb9   :  { %v396_v33 = vpop.eup %395  ;;  %v334_v37 = vadd.f32 %v394_v34, %v333_v36 }
  0xba   :  { %v340_v35 = vmul.f32 %v396_v33, %v396_v33 }
  0xbb   :  { %397 = vtanh.f32 %v334_v37 }
  0xbc   :  { %341 = vadd.xlane.f32.xlu0 %v340_v35 }
  0xc1   :  { %v398_v38 = vpop.eup %397 }
  0xc2   :  { %v337_v39 = vmul.f32 %v398_v38, %v396_v33  ;;  %v343_v40 = vmul.f32 %v398_v38, %v398_v38 }
  0xc4   :  { %338 = vadd.xlane.f32.xlu1 %v337_v39  ;;  %344 = vadd.xlane.f32.xlu0 %v343_v40 }
 0x12f   :  { %v342_v41 = vpop.xlane.xlu0 %341 }
 0x137   :  { %v345_v42 = vpop.xlane.xlu0 %344  ;;  %v339_v52 = vpop.xlane.xlu1 %338 }
 0x138   :  { %v346_v43 = vmul.f32 %v345_v42, %v342_v41 }
 0x13a   :  { %v347_v44 = vadd.f32 1e-12, %v346_v43 }
 0x13c   :  { %399 = vrsqrt.f32 %v347_v44  ;;  %vm354_vm8 = vweird.f32 %v347_v44 }
 0x142   :  { %v400_v45 = vpop.eup %399 }
 0x143   :  { %v349_v46 = vmul.f32 %v400_v45, %v347_v44  ;;  %vm355_vm7 = vweird.f32 %v400_v45 }
 0x144   :  { %vm356_vm9 = vmor %vm354_vm8, %vm355_vm7 }
 0x145   :  { %v350_v47 = vmul.f32 %v400_v45, %v349_v46 }
 0x147   :  { %v351_v48 = vmul.f32 0.5, %v350_v47 }
 0x149   :  { %v352_v49 = vsub.f32 1.5, %v351_v48 }
 0x14b   :  { %v353_v51 = vmul.f32 %v400_v45, %v352_v49 }
 0x14d   :  { %v357_v53 = vsel %vm356_vm9, %v400_v45, %v353_v51 }
 0x14e   :  { %v358_v54 = vmul.f32 %v357_v53, %v339_v52 }
 0x150   :  { %v359_v56 = vsub.f32 1.0, %v358_v54 }
 0x152   :  { %v363_v57 = vperm.slane %v359_v56, %v362_v55 }
 0x154   :  { %366 = vst.msk [vmem:[#allocation12] sm:$0x1] %vm365_vm10, %v363_v57 }
 0x155   :  { %377 = dma.vmem_to_hbm [thread:$0]  %s373_s5, 16, %s375_s21, [#allocation6]  }
 0x156   :  { %527 = dma.done.wait [#allocation6], 16  }
 0x157   :  { %528 = vsyncadd [#allocation6], 4294967280 }
 0x158   :  { %382 = vsyncpa [#allocation5], 1 }
 0x159   :  { %383 = vsyncpa [#allocation8], 1 }
 0x15a   :  { %384 = vsyncpa [#allocation11], 1 }
 0x15b   :  { %385 = vsyncpa [#allocation6], 1 }

</bundles_post_ra>
